<compile_context>
chip_gen: v6e
topology: v6e:2x2x1
jax: 0.10.0
libtpu: 0.0.40
codegen_flags: <defaults>
</compile_context>

<pallas_src>
import functools

import jax
import jax.numpy as jnp
from jax import lax
from jax.experimental import pallas as pl
from jax.experimental.pallas import tpu as pltpu


def _conv3x3_kernel(x_ref, w_ref, o_ref, patches_ref, *, H, W):
    """3x3 'same' conv for one batch element, transposed / lane-dense layout.

    x_ref:       (1, Cin, H*W)   bf16, channels-first, flattened spatial, UNpadded
    w_ref:       (Cout, 9*Cin)   bf16, K index = (ky*3 + kx)*Cin + cin
    o_ref:       (1, Cout, H*W)  f32, channels-first conv output (lane-dense)
    patches_ref: (9*Cin, H*W)    f32 scratch for the im2col patch matrix
    """
    Cin = x_ref.shape[1]
    HW = H * W

    # bf16 in HBM/VMEM (half the DMA bytes); upcast once, do elementwise in f32.
    x = x_ref[0].astype(jnp.float32)                       # (Cin, HW)

    # In-register zero halo on the flattened spatial axis (replaces wrapper pad):
    # a shift of +/-(W+1) covers every tap offset, so out-of-range rows read 0.
    zpad = jnp.zeros((Cin, W + 1), dtype=x.dtype)
    xp = jnp.concatenate([zpad, x, zpad], axis=1)          # (Cin, HW + 2W + 2)

    # Column index of every output pixel, for masking the left/right image edges
    # (row out-of-range is already covered by the zero halo above).
    col = lax.broadcasted_iota(jnp.int32, (1, HW), 1) % W
    not_left = col != 0            # tap kx == 0 reads w-1: invalid where w == 0
    not_right = col != (W - 1)     # tap kx == 2 reads w+1: invalid where w == W-1

    # im2col: pack the 9 shifted/masked taps into (9*Cin, HW).
    for ky in range(3):
        for kx in range(3):
            delta = (ky - 1) * W + (kx - 1)
            start = (W + 1) + delta                        # static Python int
            t = xp[:, start:start + HW]                    # (Cin, HW)
            if kx == 0:
                t = jnp.where(not_left, t, 0.0)
            elif kx == 2:
                t = jnp.where(not_right, t, 0.0)
            k0 = (ky * 3 + kx) * Cin
            patches_ref[k0:k0 + Cin, :] = t

    # One MXU contraction: (Cout, 9*Cin) @ (9*Cin, HW) -> (Cout, HW), f32 acc.
    patches = patches_ref[...].astype(jnp.bfloat16)
    acc = jnp.dot(w_ref[...], patches,
                  preferred_element_type=jnp.float32)      # (Cout, HW)
    o_ref[0] = acc.astype(o_ref.dtype)


def conv3x3_same_cf(x_bhwc, w_hwio):
    """3x3 stride-1 'same' conv, no bias. Returns channels-first (B, Cout, H*W) f32."""
    B, H, W, Cin = x_bhwc.shape
    Cout = w_hwio.shape[-1]
    HW = H * W

    # Channels-first flattened spatial, bf16 for the MXU (lane-dense input block).
    xt = x_bhwc.reshape(B, HW, Cin).transpose(0, 2, 1).astype(jnp.bfloat16)
    # Weight as (Cout, 9*Cin) with K index = (ky*3 + kx)*Cin + cin.
    wt = w_hwio.transpose(3, 0, 1, 2).reshape(Cout, 9 * Cin).astype(jnp.bfloat16)

    kernel = functools.partial(_conv3x3_kernel, H=H, W=W)

    return pl.pallas_call(
        kernel,
        out_shape=jax.ShapeDtypeStruct((B, Cout, HW), jnp.float32),
        grid_spec=pltpu.PrefetchScalarGridSpec(
            num_scalar_prefetch=0,
            grid=(B,),
            in_specs=[
                pl.BlockSpec((1, Cin, HW), lambda b: (b, 0, 0)),
                pl.BlockSpec((Cout, 9 * Cin), lambda b: (0, 0)),
            ],
            out_specs=pl.BlockSpec((1, Cout, HW), lambda b: (b, 0, 0)),
            scratch_shapes=[pltpu.VMEM((9 * Cin, HW), jnp.float32)],
        ),
        compiler_params=pltpu.CompilerParams(
            dimension_semantics=("parallel",)),
    )(xt, wt)


def upsample_forward(x_bhwc, w_hwio):
    """Equivalent of Upsample.forward: (B, H, W, n_feat) -> (B, 2H, 2W, n_feat//2)."""
    B, H, W, _ = x_bhwc.shape
    Cout = w_hwio.shape[-1]
    Cf = Cout // 4

    conv = conv3x3_same_cf(x_bhwc, w_hwio)                 # (B, Cout, H*W)

    # PixelShuffle(2) (torch NCHW semantics) + the final `b c h w -> b h w c`
    # permute, fused into ONE transpose of the channels-first kernel output:
    #   out[b, 2h+i, 2w+j, cf] = conv[b, cf*4 + i*2 + j, h*W + w]
    y = conv.reshape(B, Cf, 2, 2, H, W)
    y = y.transpose(0, 4, 2, 5, 3, 1).reshape(B, 2 * H, 2 * W, Cf)
    return y.astype(x_bhwc.dtype)


if __name__ == "__main__":
    key = jax.random.PRNGKey(0)
    k_x, k_w = jax.random.split(key)

    # Small shapes: batch=2, n_feat=4, spatial 16x16.
    # Conv2d(n_feat, 2*n_feat, 3, padding=1, bias=False) weight stored HWIO.
    B, H, W, n_feat = 2, 16, 16, 4
    x = jax.random.normal(k_x, (B, H, W, n_feat), dtype=jnp.float32)
    w = jax.random.normal(k_w, (3, 3, n_feat, 2 * n_feat), dtype=jnp.float32) * 0.1

    out = jax.block_until_ready(jax.jit(upsample_forward)(x, w))
    assert out.shape == (B, 2 * H, 2 * W, n_feat // 2), out.shape

    # Reference: XLA conv on the same bf16-rounded inputs (the kernel's matmul
    # precision, f32 accumulation), then an independently written torch-style
    # PixelShuffle(2) in NCHW followed by the NCHW->NHWC permute.
    ref_conv = lax.conv_general_dilated(
        x.astype(jnp.bfloat16), w.astype(jnp.bfloat16),
        window_strides=(1, 1), padding="SAME",
        dimension_numbers=("NHWC", "HWIO", "NHWC"),
        preferred_element_type=jnp.float32)                # (B, H, W, 2*n_feat)
    Cf = (2 * n_feat) // 4
    rc = ref_conv.transpose(0, 3, 1, 2)                    # NCHW
    rc = rc.reshape(B, Cf, 2, 2, H, W).transpose(0, 1, 4, 2, 5, 3)
    rc = rc.reshape(B, Cf, 2 * H, 2 * W)                   # PixelShuffle(2), NCHW
    ref = rc.transpose(0, 2, 3, 1)                         # back to NHWC

    err = float(jnp.max(jnp.abs(out - ref)))
    assert err < 1e-3, err
    print("KERNEL_OK")
</pallas_src>

<mosaic_0001>
module attributes {stable_mosaic.version = 11 : i64} {
  func.func @_conv3x3_kernel(%arg0: i32, %arg1: memref<1x4x256xbf16, #tpu.memory_space<vmem>>, %arg2: memref<8x36xbf16, #tpu.memory_space<vmem>>, %arg3: memref<1x8x256xf32, #tpu.memory_space<vmem>>, %arg4: memref<36x256xf32, #tpu.memory_space<vmem>>) attributes {dimension_semantics = [#tpu.dimension_semantics<parallel>], iteration_bounds = array<i64: 2>, scalar_prefetch = 0 : i64, scratch_operands = 1 : i64, tpu.core_type = #tpu.core_type<tc>, window_params = [{transform_indices = @transform_0, window_bounds = array<i64: 1, 4, 256>}, {pipeline_mode = #tpu.pipeline_mode<synchronous>, transform_indices = @transform_1, window_bounds = array<i64: 8, 36>}, {transform_indices = @transform_2, window_bounds = array<i64: 1, 8, 256>}]} {
    %c0 = arith.constant 0 : index
    %c0_0 = arith.constant 0 : index
    %c0_1 = arith.constant 0 : index
    %0 = vector.load %arg1[%c0, %c0_0, %c0_1] : memref<1x4x256xbf16, #tpu.memory_space<vmem>>, vector<1x4x256xbf16>
    %1 = vector.shape_cast %0 : vector<1x4x256xbf16> to vector<4x256xbf16>
    %2 = arith.extf %1 : vector<4x256xbf16> to vector<4x256xf32>
    %cst = arith.constant 0.000000e+00 : f32
    %3 = vector.broadcast %cst : f32 to vector<4x17xf32>
    %4 = tpu.concatenate %3, %2, %3 in 1 : vector<4x17xf32>, vector<4x256xf32>, vector<4x17xf32> -> vector<4x290xf32>
    %5 = tpu.iota {dimensions = array<i32: 1>} : vector<1x256xi32>
    %c16_i32 = arith.constant 16 : i32
    %c0_i32 = arith.constant 0 : i32
    %6 = arith.cmpi eq, %c16_i32, %c0_i32 : i32
    %c1_i32 = arith.constant 1 : i32
    %7 = arith.select %6, %c1_i32, %c16_i32 : i32
    %8 = vector.broadcast %7 : i32 to vector<1x256xi32>
    %9 = arith.remsi %5, %8 : vector<1x256xi32>
    %c0_i32_2 = arith.constant 0 : i32
    %10 = vector.broadcast %c0_i32_2 : i32 to vector<1x256xi32>
    %11 = arith.cmpi ne, %9, %10 : vector<1x256xi32>
    %c0_i32_3 = arith.constant 0 : i32
    %12 = vector.broadcast %c0_i32_3 : i32 to vector<1x256xi32>
    %13 = arith.cmpi slt, %9, %12 : vector<1x256xi32>
    %c0_i32_4 = arith.constant 0 : i32
    %14 = arith.cmpi slt, %7, %c0_i32_4 : i32
    %15 = vector.broadcast %14 : i1 to vector<1x256xi1>
    %16 = vector.broadcast %15 : vector<1x256xi1> to vector<1x256xi1>
    %17 = arith.xori %13, %16 : vector<1x256xi1>
    %18 = arith.andi %17, %11 : vector<1x256xi1>
    %19 = vector.broadcast %7 : i32 to vector<1x256xi32>
    %20 = arith.addi %9, %19 : vector<1x256xi32>
    %21 = arith.select %18, %20, %9 : vector<1x256xi1>, vector<1x256xi32>
    %c0_i32_5 = arith.constant 0 : i32
    %22 = vector.broadcast %c0_i32_5 : i32 to vector<1x256xi32>
    %23 = arith.cmpi ne, %21, %22 : vector<1x256xi32>
    %c15_i32 = arith.constant 15 : i32
    %24 = vector.broadcast %c15_i32 : i32 to vector<1x256xi32>
    %25 = arith.cmpi ne, %21, %24 : vector<1x256xi32>
    %26 = vector.extract_strided_slice %4 {offsets = [0, 0], sizes = [4, 256], strides = [1, 1]} : vector<4x290xf32> to vector<4x256xf32>
    %cst_6 = arith.constant 0.000000e+00 : f32
    %27 = vector.shape_cast %23 : vector<1x256xi1> to vector<1x256xi1>
    %28 = vector.broadcast %27 : vector<1x256xi1> to vector<4x256xi1>
    %29 = vector.broadcast %cst_6 : f32 to vector<4x256xf32>
    %30 = arith.select %28, %26, %29 : vector<4x256xi1>, vector<4x256xf32>
    %c0_7 = arith.constant 0 : index
    %c0_8 = arith.constant 0 : index
    %31 = vector.load %arg4[%c0_7, %c0_8] : memref<36x256xf32, #tpu.memory_space<vmem>>, vector<4x256xf32>
    tpu.vector_store %arg4[%c0_7, %c0_8], %30 {strides = array<i32>} : memref<36x256xf32, #tpu.memory_space<vmem>>, vector<4x256xf32>,
    %32 = vector.extract_strided_slice %4 {offsets = [0, 1], sizes = [4, 256], strides = [1, 1]} : vector<4x290xf32> to vector<4x256xf32>
    %c4 = arith.constant 4 : index
    %c0_9 = arith.constant 0 : index
    %33 = vector.load %arg4[%c4, %c0_9] : memref<36x256xf32, #tpu.memory_space<vmem>>, vector<4x256xf32>
    tpu.vector_store %arg4[%c4, %c0_9], %32 {strides = array<i32>} : memref<36x256xf32, #tpu.memory_space<vmem>>, vector<4x256xf32>,
    %34 = vector.extract_strided_slice %4 {offsets = [0, 2], sizes = [4, 256], strides = [1, 1]} : vector<4x290xf32> to vector<4x256xf32>
    %cst_10 = arith.constant 0.000000e+00 : f32
    %35 = vector.shape_cast %25 : vector<1x256xi1> to vector<1x256xi1>
    %36 = vector.broadcast %35 : vector<1x256xi1> to vector<4x256xi1>
    %37 = vector.broadcast %cst_10 : f32 to vector<4x256xf32>
    %38 = arith.select %36, %34, %37 : vector<4x256xi1>, vector<4x256xf32>
    %c8 = arith.constant 8 : index
    %c0_11 = arith.constant 0 : index
    %39 = vector.load %arg4[%c8, %c0_11] : memref<36x256xf32, #tpu.memory_space<vmem>>, vector<4x256xf32>
    tpu.vector_store %arg4[%c8, %c0_11], %38 {strides = array<i32>} : memref<36x256xf32, #tpu.memory_space<vmem>>, vector<4x256xf32>,
    %40 = vector.extract_strided_slice %4 {offsets = [0, 16], sizes = [4, 256], strides = [1, 1]} : vector<4x290xf32> to vector<4x256xf32>
    %cst_12 = arith.constant 0.000000e+00 : f32
    %41 = vector.shape_cast %23 : vector<1x256xi1> to vector<1x256xi1>
    %42 = vector.broadcast %41 : vector<1x256xi1> to vector<4x256xi1>
    %43 = vector.broadcast %cst_12 : f32 to vector<4x256xf32>
    %44 = arith.select %42, %40, %43 : vector<4x256xi1>, vector<4x256xf32>
    %c12 = arith.constant 12 : index
    %c0_13 = arith.constant 0 : index
    %45 = vector.load %arg4[%c12, %c0_13] : memref<36x256xf32, #tpu.memory_space<vmem>>, vector<4x256xf32>
    tpu.vector_store %arg4[%c12, %c0_13], %44 {strides = array<i32>} : memref<36x256xf32, #tpu.memory_space<vmem>>, vector<4x256xf32>,
    %46 = vector.extract_strided_slice %4 {offsets = [0, 17], sizes = [4, 256], strides = [1, 1]} : vector<4x290xf32> to vector<4x256xf32>
    %c16 = arith.constant 16 : index
    %c0_14 = arith.constant 0 : index
    %47 = vector.load %arg4[%c16, %c0_14] : memref<36x256xf32, #tpu.memory_space<vmem>>, vector<4x256xf32>
    tpu.vector_store %arg4[%c16, %c0_14], %46 {strides = array<i32>} : memref<36x256xf32, #tpu.memory_space<vmem>>, vector<4x256xf32>,
    %48 = vector.extract_strided_slice %4 {offsets = [0, 18], sizes = [4, 256], strides = [1, 1]} : vector<4x290xf32> to vector<4x256xf32>
    %cst_15 = arith.constant 0.000000e+00 : f32
    %49 = vector.shape_cast %25 : vector<1x256xi1> to vector<1x256xi1>
    %50 = vector.broadcast %49 : vector<1x256xi1> to vector<4x256xi1>
    %51 = vector.broadcast %cst_15 : f32 to vector<4x256xf32>
    %52 = arith.select %50, %48, %51 : vector<4x256xi1>, vector<4x256xf32>
    %c20 = arith.constant 20 : index
    %c0_16 = arith.constant 0 : index
    %53 = vector.load %arg4[%c20, %c0_16] : memref<36x256xf32, #tpu.memory_space<vmem>>, vector<4x256xf32>
    tpu.vector_store %arg4[%c20, %c0_16], %52 {strides = array<i32>} : memref<36x256xf32, #tpu.memory_space<vmem>>, vector<4x256xf32>,
    %54 = vector.extract_strided_slice %4 {offsets = [0, 32], sizes = [4, 256], strides = [1, 1]} : vector<4x290xf32> to vector<4x256xf32>
    %cst_17 = arith.constant 0.000000e+00 : f32
    %55 = vector.shape_cast %23 : vector<1x256xi1> to vector<1x256xi1>
    %56 = vector.broadcast %55 : vector<1x256xi1> to vector<4x256xi1>
    %57 = vector.broadcast %cst_17 : f32 to vector<4x256xf32>
    %58 = arith.select %56, %54, %57 : vector<4x256xi1>, vector<4x256xf32>
    %c24 = arith.constant 24 : index
    %c0_18 = arith.constant 0 : index
    %59 = vector.load %arg4[%c24, %c0_18] : memref<36x256xf32, #tpu.memory_space<vmem>>, vector<4x256xf32>
    tpu.vector_store %arg4[%c24, %c0_18], %58 {strides = array<i32>} : memref<36x256xf32, #tpu.memory_space<vmem>>, vector<4x256xf32>,
    %60 = vector.extract_strided_slice %4 {offsets = [0, 33], sizes = [4, 256], strides = [1, 1]} : vector<4x290xf32> to vector<4x256xf32>
    %c28 = arith.constant 28 : index
    %c0_19 = arith.constant 0 : index
    %61 = vector.load %arg4[%c28, %c0_19] : memref<36x256xf32, #tpu.memory_space<vmem>>, vector<4x256xf32>
    tpu.vector_store %arg4[%c28, %c0_19], %60 {strides = array<i32>} : memref<36x256xf32, #tpu.memory_space<vmem>>, vector<4x256xf32>,
    %62 = vector.extract_strided_slice %4 {offsets = [0, 34], sizes = [4, 256], strides = [1, 1]} : vector<4x290xf32> to vector<4x256xf32>
    %cst_20 = arith.constant 0.000000e+00 : f32
    %63 = vector.shape_cast %25 : vector<1x256xi1> to vector<1x256xi1>
    %64 = vector.broadcast %63 : vector<1x256xi1> to vector<4x256xi1>
    %65 = vector.broadcast %cst_20 : f32 to vector<4x256xf32>
    %66 = arith.select %64, %62, %65 : vector<4x256xi1>, vector<4x256xf32>
    %c32 = arith.constant 32 : index
    %c0_21 = arith.constant 0 : index
    %67 = vector.load %arg4[%c32, %c0_21] : memref<36x256xf32, #tpu.memory_space<vmem>>, vector<4x256xf32>
    tpu.vector_store %arg4[%c32, %c0_21], %66 {strides = array<i32>} : memref<36x256xf32, #tpu.memory_space<vmem>>, vector<4x256xf32>,
    %c0_22 = arith.constant 0 : index
    %c0_23 = arith.constant 0 : index
    %68 = vector.load %arg4[%c0_22, %c0_23] : memref<36x256xf32, #tpu.memory_space<vmem>>, vector<36x256xf32>
    %69 = arith.truncf %68 : vector<36x256xf32> to vector<36x256xbf16>
    %c0_24 = arith.constant 0 : index
    %c0_25 = arith.constant 0 : index
    %70 = vector.load %arg2[%c0_24, %c0_25] : memref<8x36xbf16, #tpu.memory_space<vmem>>, vector<8x36xbf16>
    %cst_26 = arith.constant dense<0.000000e+00> : vector<8x256xf32>
    %71 = tpu.matmul %70, %69, %cst_26 {dimension_numbers = #tpu.dot_dimension_numbers<[1], [0], [0], [1], [0, 0, 1, 1], [], []>} : vector<8x36xbf16>, vector<36x256xbf16>, vector<8x256xf32> -> vector<8x256xf32>
    %c0_27 = arith.constant 0 : index
    %c0_28 = arith.constant 0 : index
    %c0_29 = arith.constant 0 : index
    %72 = vector.load %arg3[%c0_27, %c0_28, %c0_29] : memref<1x8x256xf32, #tpu.memory_space<vmem>>, vector<1x8x256xf32>
    %73 = vector.shape_cast %72 : vector<1x8x256xf32> to vector<8x256xf32>
    %74 = vector.shape_cast %71 : vector<8x256xf32> to vector<1x8x256xf32>
    tpu.vector_store %arg3[%c0_27, %c0_28, %c0_29], %74 {strides = array<i32>} : memref<1x8x256xf32, #tpu.memory_space<vmem>>, vector<1x8x256xf32>,
    return
  }
  func.func @transform_0(%arg0: i32) -> (i32, i32, i32) {
    %c0_i32 = arith.constant 0 : i32
    %c0_i32_0 = arith.constant 0 : i32
    %c0_i32_1 = arith.constant 0 : i32
    return %arg0, %c0_i32, %c0_i32_0 : i32, i32, i32
  }
  func.func @transform_1(%arg0: i32) -> (i32, i32) {
    %c0_i32 = arith.constant 0 : i32
    %c0_i32_0 = arith.constant 0 : i32
    %c0_i32_1 = arith.constant 0 : i32
    return %c0_i32, %c0_i32_0 : i32, i32
  }
  func.func @transform_2(%arg0: i32) -> (i32, i32, i32) {
    %c0_i32 = arith.constant 0 : i32
    %c0_i32_0 = arith.constant 0 : i32
    %c0_i32_1 = arith.constant 0 : i32
    return %arg0, %c0_i32, %c0_i32_0 : i32, i32, i32
  }
}

</mosaic_0001>

<bundles_post_ra>
// kernel: upsample_forward.1
= control target key start
LH: loop header
LB: loop body
LE: loop exit
PB: predicated region body
PF: predicated region fallthrough
CT: control target
= control target key end

     0   :  { %s571_s9 = smov 0   ;;  %s647_s0 = inlined_call_operand.vmem [shape: bf16[2,4,256], index: 0, kind: input, shape index: {}]   ;;  %s648_s1 = inlined_call_operand.vmem [shape: bf16[8,36], index: 1, kind: input, shape index: {}]   ;;  %s649_s2 = inlined_call_operand.vmem [shape: f32[2,8,256], index: 2, kind: output, shape index: {}]  }
   0x1 LB: > { %s460_s10 = sadd.s32 4294967295, %s544_s9   ;;  %p464_p0 = scmp.ge.s32.totalorder %s544_s9, 1  ;;  %s544_s9 = sphi %s571_s9, %s12_s9  }
   0x2   : > { %p112_p1 = scmp.lt.s32.totalorder %s544_s9, 3 }
   0x4   : > { %p113_p2 = pnand %p464_p0, %p112_p1 }
   0x5   : > { %p134_p3 = scmp.lt.s32.totalorder (!%p113_p2), %s460_s10, 1  ;;  %s546_s15 = smov (!%p113_p2), 17  }
   0x6   : > { %116 = sbr.rel (%p113_p2) target bundleno = 496 (0x1f0), region = 28  ;;  %s547_s16 = smov (!%p113_p2), 96  }
   0x7   : > { %s548_s17 = smov (!%p113_p2), 110   ;;  %s549_s18 = smov (!%p113_p2), 94  }
   0x8   : > { %s550_s19 = smov (!%p113_p2), 111   ;;  %s551_s20 = smov (!%p113_p2), 112  }
   0x9   : > { %s552_s21 = smov (!%p113_p2), 95   ;;  %s553_s22 = smov (!%p113_p2), 126  }
   0xa   : > { %s554_s23 = smov (!%p113_p2), 127  }
   0xb   : > { %s659_s10 = smov (!%p134_p3, %s460_s10), 1  ;;  %v160_v4 = vlaneseq  ;;  %vm153_vm0 = vcmask 138240   ;;  %v555_v25 = vmov 0   ;;  %vm276_vm3 = vcmask 900096  }
   0xc   : > { %s473_s11 = sshll.u32 %s659_s10, 2  ;;  %394 = vmatprep.mubr.bf16.mxu0 %v555_v25  ;;  %vm297_vm6 = vcmask 785408   ;;  %vm325_vm7 = vcmask 769024   ;;  %vm242_vm8 = vcmask 916480   ;;  %vm263_vm9 = vcmask 908288   ;;  %s474_s26 = sshll.u32 %s659_s10, 4 }
   0xd   : > { %s138_s14 = scalar_lea.vmem %s647_s0, %s473_s11  ;;  %v161_v5 = vand.u32 127, %v160_v4  ;;  %vm312_vm10 = vcmask 777216   ;;  %vm355_vm11 = vcmask 1041408   ;;  %vm227_vm12 = vcmask 1031168   ;;  %s143_s29 = scalar_lea.vmem %s649_s2, %s474_s26 }
   0xe   : > { %v145_v0 = vld [vmem:[%s138_s14] sm:$0xf]  ;;  %vm210_vm13 = vcmask 1039360   ;;  %vm351_vm14 = vcmask 293888  }
   0xf   : > { %v146_v1 = vunpack.c.l.bf16 %v145_v0  ;;  %v162_v6 = vadd.s32 128, %v161_v5  ;;  %v167_v9 = vand.u32 15, %v161_v5 }
  0x11   : > { %v148_v2 = vcombine.high %v146_v1, %v146_v1  ;;  %v174_v7 = vand.u32 15, %v162_v6  ;;  %vm589_vm2 = vcmp.ne.s32.totalorder %v167_v9, 0  ;;  %vm601_vm5 = vcmp.ne.s32.totalorder %v167_v9, 15 }
  0x13   : > { %v493_v3 = vpack.i.bf16 %v148_v2, %v146_v1  ;;  %vm585_vm1 = vcmp.ne.s32.totalorder %v174_v7, 0  ;;  %vm597_vm4 = vcmp.ne.s32.totalorder %v174_v7, 15 }
  0x15   : > { %494 = vrot.lane.b32.xlu0 %v493_v3, %s546_s15 }
  0x87   : > { %v495_v8 = vpop.permute.xlu0 %494 }
  0x88   : > { %v497_v10 = vunpack.i.h.bf16 %v495_v8  ;;  %v496_v11 = vunpack.i.l.bf16 %v495_v8 }
  0x8a   : > { %v154_v12 = vsel %vm153_vm0, %v496_v11, %v497_v10  ;;  %v158_v13 = vsel %vm153_vm0, 0.0, %v496_v11  ;;  %v159_v17 = vsel %vm153_vm0, %v497_v10, 0.0 }
  0x8b   : > { %291 = vrot.lane.b32.xlu1 %v158_v13, %s547_s16  ;;  %270 = vrot.lane.b32.xlu0 %v158_v13, %s548_s17  ;;  %v196_v16 = vsel %vm585_vm1, %v154_v12, 0.0  ;;  %v195_v18 = vsel %vm589_vm2, %v158_v13, 0.0  ;;  %v503_v19 = vpack.i.bf16 %v159_v17, %v154_v12  ;;  %v498_v20 = vpack.i.bf16 %v154_v12, %v158_v13 }
  0x8c   : > { %198 = vst [vmem:[#allocation2] sm:$0xf] %v196_v16  ;;  %197 = vst [vmem:[#allocation2 + $0x30] sm:$0xf] %v195_v18  ;;  %v202_v21 = vrot.slane %v154_v12, 4  ;;  %v203_v22 = vrot.slane %v159_v17, 4 }
  0x8d   : > { %v201_v23 = vrot.slane %v158_v13, 4 }
  0x8e   : > { %v528_v24 = vpack.i.bf16 %v203_v22, %v202_v21 }
  0x8f   : > { %323 = vrot.lane.b32.xlu1 %v159_v17, %s549_s18  ;;  %257 = vrot.lane.b32.xlu0 %v158_v13, %s550_s19 }
  0x93   : > { %236 = vrot.lane.b32.xlu0 %v158_v13, %s551_s20  ;;  %504 = vrot.lane.b32.xlu1 %v503_v19, %s548_s17 }
  0x97   : > { %509 = vrot.lane.b32.xlu1 %v503_v19, %s547_s16  ;;  %499 = vrot.lane.b32.xlu0 %v498_v20, %s549_s18 }
  0x9b   : > { %519 = vrot.lane.b32.xlu1 %v503_v19, %s551_s20  ;;  %514 = vrot.lane.b32.xlu0 %v503_v19, %s550_s19 }
  0x9f   : > { %306 = vrot.lane.b32.xlu1 %v201_v23, %s552_s21  ;;  %529 = vrot.lane.b32.xlu0 %v528_v24, %s552_s21 }
  0xa3   : > { %524 = vrot.lane.b32.xlu1 %v503_v19, %s553_s22  ;;  %534 = vrot.lane.b32.xlu0 %v528_v24, %s554_s23 }
  0xa7   : > { %221 = vrot.lane.b32.xlu1 %v158_v13, %s553_s22  ;;  %204 = vrot.lane.b32.xlu0 %v201_v23, %s554_s23 }
  0xfd   : > { %v292_v26 = vpop.permute.xlu1 %291  ;;  %v271_v27 = vpop.permute.xlu0 %270 }
 0x101   : > { %v324_v28 = vpop.permute.xlu1 %323  ;;  %v258_v29 = vpop.permute.xlu0 %257 }
 0x105   : > { %v237_v30 = vpop.permute.xlu0 %236  ;;  %v505_v31 = vpop.permute.xlu1 %504 }
 0x106   : > { %v507_v33 = vunpack.i.h.bf16 %v505_v31  ;;  %v506_v34 = vunpack.i.l.bf16 %v505_v31 }
 0x108   : > { %v277_v36 = vsel %vm276_vm3, %v271_v27, %v506_v34  ;;  %v278_v37 = vsel %vm276_vm3, %v506_v34, %v507_v33 }
 0x109   : > { %v282_v38 = vsel %vm597_vm4, %v278_v37, 0.0  ;;  %v510_v39 = vpop.permute.xlu1 %509  ;;  %v500_v40 = vpop.permute.xlu0 %499  ;;  %v281_v41 = vsel %vm601_vm5, %v277_v36, 0.0 }
 0x10a   : > { %v286_v42 = vrot.slane %v282_v38, 4  ;;  %v512_v43 = vunpack.i.h.bf16 %v510_v39  ;;  %v511_v44 = vunpack.i.l.bf16 %v510_v39  ;;  %v502_v45 = vunpack.i.h.bf16 %v500_v40 }
 0x10b   : > { %v501_v46 = vunpack.i.l.bf16 %v500_v40  ;;  %v285_v47 = vrot.slane %v281_v41, 4 }
 0x10c   : > { %290 = vst [vmem:[#allocation2 + $0x28] sm:$0xf0] %v286_v42  ;;  %v298_v48 = vsel %vm297_vm6, %v292_v26, %v511_v44  ;;  %v299_v49 = vsel %vm297_vm6, %v511_v44, %v512_v43  ;;  %v327_v50 = vsel %vm325_vm7, %v502_v45, %v324_v28  ;;  %v350_v43 = vld [vmem:[%s648_s1] sm:$0xf] }
 0x10d   : > { %v303_v51 = vsel %vm585_vm1, %v299_v49, 0.0  ;;  %v331_v52 = vsel %vm597_vm4, %v327_v50, 0.0  ;;  %v326_v53 = vsel %vm325_vm7, %v501_v46, %v502_v45  ;;  %v520_v54 = vpop.permute.xlu1 %519  ;;  %v515_v55 = vpop.permute.xlu0 %514  ;;  %289 = vst [vmem:[#allocation2 + $0x48] sm:$0xf0] %v285_v47  ;;  %v302_v56 = vsel %vm589_vm2, %v298_v48, 0.0 }
 0x10e   : > { %305 = vst [vmem:[#allocation2 + $0x20] sm:$0xf] %v303_v51  ;;  %333 = vst [vmem:[#allocation2 + $0x38] sm:$0xf] %v331_v52  ;;  %v522_v57 = vunpack.i.h.bf16 %v520_v54  ;;  %v521_v58 = vunpack.i.l.bf16 %v520_v54  ;;  %v517_v59 = vunpack.i.h.bf16 %v515_v55  ;;  %v516_v60 = vunpack.i.l.bf16 %v515_v55 }
 0x10f   : > { %304 = vst [vmem:[#allocation2 + $0x8] sm:$0xf] %v302_v56  ;;  %v330_v61 = vsel %vm601_vm5, %v326_v53, 0.0 }
 0x110   : > { %v243_v62 = vsel %vm242_vm8, %v237_v30, %v521_v58  ;;  %v244_v63 = vsel %vm242_vm8, %v521_v58, %v522_v57  ;;  %v264_v0 = vsel %vm263_vm9, %v258_v29, %v516_v60  ;;  %v265_v1 = vsel %vm263_vm9, %v516_v60, %v517_v59  ;;  %332 = vst [vmem:[#allocation2 + $0x40] sm:$0xf] %v330_v61 }
 0x111   : > { %v248_v2 = vsel %vm585_vm1, %v244_v63, 0.0  ;;  %268 = vst [vmem:[#allocation2 + $0x48] sm:$0xf] %v264_v0  ;;  %269 = vst [vmem:[#allocation2 + $0x28] sm:$0xf] %v265_v1  ;;  %v307_v3 = vpop.permute.xlu1 %306  ;;  %v530_v4 = vpop.permute.xlu0 %529  ;;  %v247_v5 = vsel %vm589_vm2, %v243_v62, 0.0 }
 0x112   : > { %v252_v6 = vrot.slane %v248_v2, 4  ;;  %v532_v7 = vunpack.i.h.bf16 %v530_v4  ;;  %v531_v8 = vunpack.i.l.bf16 %v530_v4  ;;  %v251_v9 = vrot.slane %v247_v5, 4 }
 0x114   : > { %256 = vst [vmem:[#allocation2 + $0x10] sm:$0xf0] %v252_v6  ;;  %v313_v10 = vsel %vm312_vm10, %v307_v3, %v531_v8  ;;  %v314_v11 = vsel %vm312_vm10, %v531_v8, %v532_v7  ;;  %255 = vst [vmem:[#allocation2 + $0x18] sm:$0xf0] %v251_v9 }
 0x115   : > { %317 = vst [vmem:[#allocation2 + $0x8] sm:$0xf0] %v313_v10  ;;  %318 = vst [vmem:[#allocation2 + $0x20] sm:$0xf0] %v314_v11  ;;  %v525_v12 = vpop.permute.xlu1 %524  ;;  %v535_v13 = vpop.permute.xlu0 %534  ;;  %v343_v14 = vld [vmem:[#allocation2 + $0x38] sm:$0xf] }
 0x116   : > { %v527_v16 = vunpack.i.h.bf16 %v525_v12  ;;  %v526_v17 = vunpack.i.l.bf16 %v525_v12  ;;  %v537_v15 = vunpack.i.h.bf16 %v535_v13  ;;  %v536_v18 = vunpack.i.l.bf16 %v535_v13 }
 0x117   : > { %v349_v19 = vpack.c.bf16 %v343_v14, %v343_v14  ;;  %v342_v20 = vld [vmem:[#allocation2 + $0x40] sm:$0xf] }
 0x118   : > { %v229_v21 = vsel %vm227_vm12, %v526_v17, %v527_v16  ;;  %v348_v22 = vpack.c.bf16 %v342_v20, %v342_v20  ;;  %v212_v23 = vsel %vm210_vm13, %v536_v18, %v537_v15  ;;  %v339_v31 = vld [vmem:[#allocation2 + $0x28] sm:$0xff] }
 0x119   : > { %469 = vmatprep.subr.msk.bf16.mxu0 %vm355_vm11, %v349_v19  ;;  %v222_v24 = vpop.permute.xlu1 %221  ;;  %v233_v25 = vsel %vm597_vm4, %v229_v21, 0.0  ;;  %v205_v26 = vpop.permute.xlu0 %204  ;;  %216 = vst [vmem:[#allocation2] sm:$0xf0] %v212_v23  ;;  %v338_v34 = vld [vmem:[#allocation2 + $0x48] sm:$0xff] }
 0x11a   : > { %v228_v27 = vsel %vm227_vm12, %v222_v24, %v526_v17  ;;  %235 = vst [vmem:[#allocation2 + $0x10] sm:$0xf] %v233_v25  ;;  %v357_v28 = vsel %vm355_vm11, %v348_v22, 0  ;;  %v211_v29 = vsel %vm210_vm13, %v205_v26, %v536_v18 }
 0x11b   : > { %v232_v30 = vsel %vm601_vm5, %v228_v27, 0.0  ;;  %373 = vmatpush1.bf16.msra.mxu0 %v357_v28  ;;  %215 = vst [vmem:[#allocation2 + $0x30] sm:$0xf0] %v211_v29 }
 0x11c   : > { %234 = vst [vmem:[#allocation2 + $0x18] sm:$0xf] %v232_v30  ;;  %v341_v33 = vld [vmem:[#allocation2 + $0x20] sm:$0xff]  ;;  %v340_v32 = vld [vmem:[#allocation2 + $0x8] sm:$0xff] }
 0x11d   : > { %v347_v36 = vpack.c.bf16 %v341_v33, %v339_v31  ;;  %v346_v37 = vpack.c.bf16 %v340_v32, %v338_v34 }
 0x11f   : > { %374 = vmatprep.subr.bf16.mxu0 %v347_v36 }
 0x120   : > { %375 = vmatpush1.bf16.msra.mxu0 %v346_v37  ;;  %v335_v38 = vld [vmem:[#allocation2] sm:$0xff] }
 0x121   : > { %v337_v39 = vld [vmem:[#allocation2 + $0x10] sm:$0xff] }
 0x122   : > { %v345_v40 = vpack.c.bf16 %v337_v39, %v335_v38  ;;  %v334_v41 = vld [vmem:[#allocation2 + $0x30] sm:$0xff] }
 0x123   : > { %v336_v42 = vld [vmem:[#allocation2 + $0x18] sm:$0xff] }
 0x124   : > { %376 = vmatprep.subr.bf16.mxu0 %v345_v40  ;;  %v344_v35 = vpack.c.bf16 %v336_v42, %v334_v41 }
 0x126   : > { %377 = vmatpush1.bf16.msra.mxu0 %v344_v35 }
 0x129   : > { %470 = vmatmul.mubr.msk.bf16.vlgmr.msra.gmra.mxu0 %vm351_vm14, %v350_v43 }
 0x1e9   : > { %v396_v44 = vpop.f32.mrf.mxu0 }
 0x1ea   : > { %403 = vst [vmem:[%s143_s29] sm:$0xff] %v396_v44 }
 0x1eb   : > { %v398_v45 = vpop.f32.mrf.mxu0 }
 0x1ec   : > { %404 = vst [vmem:[%s143_s29 + $0x8] sm:$0xff] %v398_v45 }
 0x1ed   : > { %v400_v46 = vpop.f32.mrf.mxu0 }
 0x1ef   : > { %v401_v47 = vpop.f32.mrf.mxu0 }
 0x1f0 PF: > { %s12_s9 = sadd.s32 1, %s544_s9  }
 0x1f1   : > { %p9_p4 = scmp.ge.s32.totalorder %s12_s9, 4  }
 0x1f3   :  { %11 = sbr.rel (!%p9_p4) target bundleno = 1 (0x1), region = 58 }

</bundles_post_ra>
